<compile_context>
chip_gen: v7x
topology: tpu7x:2x2x1
jax: 0.10.0
libtpu: 0.0.40
codegen_flags: <defaults>
</compile_context>

<pallas_src>
import jax
import jax.numpy as jnp
from jax.experimental import pallas as pl
from jax.experimental.pallas import tpu as pltpu

LATENT_DIM = 50
IN_DIM = 344
# (fan_in, fan_out) of the 6 Linear layers: encoder then decoder ('cmb' config).
LAYER_DIMS = [(IN_DIM, 200), (200, 100), (100, LATENT_DIM),
              (LATENT_DIM, 100), (100, 200), (200, IN_DIM)]

# In-kernel (padded) matmul dims.  First layer keeps K = 344 un-padded (matches the unpadded
# x block); last layer keeps N = 344 un-padded (matches the unpadded output block).  All
# internal dims are padded to 128-lane multiples.
KERNEL_DIMS = [(IN_DIM, 256),   # 344 -> 200(pad 256)
               (256, 128),      # 200(256) -> 100(128)
               (128, 128),      # 100(128) -> 50(128)
               (128, 128),      # 50(128)  -> 100(128)
               (128, 256),      # 100(128) -> 200(256)
               (256, IN_DIM)]   # 200(256) -> 344

TB_MAX = 1024   # max batch rows per grid step


def _round_up(n, m):
    return ((n + m - 1) // m) * m


def _choose_tile(B):
    """Batch rows per grid step."""
    if B < 8:
        return B                      # block dim == full array dim (always legal)
    # Aim for >= 2 grid steps so the "parallel" batch axis can shard across both
    # TensorCores on v7x (no-op on v5e/v6e); cap at TB_MAX for VMEM / pipelining.
    return max(8, min(TB_MAX, _round_up(pl.cdiv(B, 2), 8)))


# --------------------------------------------------------------------------------------
# Kernel
# --------------------------------------------------------------------------------------
def _ae_kernel(x_ref,
               w1, b1, w2, b2, w3, b3, w4, b4, w5, b5, w6, b6,
               o_ref):
    x = x_ref[...]                                   # bf16 [tb, 344]

    # Hoist bias loads once per invocation (f32, (1, N) sublane broadcast).
    b1v = b1[...]; b2v = b2[...]; b3v = b3[...]
    b4v = b4[...]; b5v = b5[...]; b6v = b6[...]

    def lin(h, w_ref, b):
        # bf16 MXU inputs, f32 accumulation; bias-add stays f32 on the VPU (v5e-safe).
        return jnp.dot(h.astype(jnp.bfloat16), w_ref[...],
                       preferred_element_type=jnp.float32) + b

    # ---- encoder ----  (Dropout treated as identity: eval semantics)
    h = jnp.maximum(lin(x, w1, b1v), 0.0)
    h = jnp.maximum(lin(h, w2, b2v), 0.0)
    z = lin(h, w3, b3v)

    # ---- decoder ----
    h = jnp.maximum(lin(z, w4, b4v), 0.0)
    h = jnp.maximum(lin(h, w5, b5v), 0.0)
    y = lin(h, w6, b6v)                              # f32 [tb, 344] (unpadded N)

    o_ref[...] = y.astype(o_ref.dtype)


# --------------------------------------------------------------------------------------
# Wrapper
# --------------------------------------------------------------------------------------
def auto_encoder_forward(x, kernel_params):
    """x: [B, 344] (bf16 preferred -- avoids an extra cast pass; any float accepted).
    kernel_params: padded bf16 weights + f32 biases from prepare_kernel_params.
    Returns f32 [B, 344]."""
    B, D = x.shape
    assert D == IN_DIM
    if x.dtype != jnp.bfloat16:
        # Kernel feeds the MXU in bf16 anyway -> bit-identical; halves input DMA bytes.
        x = x.astype(jnp.bfloat16)

    tb = _choose_tile(B)
    grid = (pl.cdiv(B, tb),)          # ragged tail: OOB writes dropped by Pallas

    x_spec = pl.BlockSpec((tb, IN_DIM), lambda i: (i, 0))
    # Weights / biases: constant index map -> fetched once, VMEM-resident across steps.
    param_specs = [pl.BlockSpec(p.shape, lambda i: (0, 0)) for p in kernel_params]
    out_spec = pl.BlockSpec((tb, IN_DIM), lambda i: (i, 0))

    flops = 2 * B * sum(ip * op for ip, op in KERNEL_DIMS)
    bytes_accessed = (B * IN_DIM * (2 + 4)            # bf16 in + f32 out
                      + sum(int(p.size) * p.dtype.itemsize for p in kernel_params))

    return pl.pallas_call(
        _ae_kernel,
        out_shape=jax.ShapeDtypeStruct((B, IN_DIM), jnp.float32),
        grid=grid,
        in_specs=[x_spec] + param_specs,
        out_specs=out_spec,
        compiler_params=pltpu.CompilerParams(
            dimension_semantics=("parallel",),
            vmem_limit_bytes=32 * 1024 * 1024),
        cost_estimate=pl.CostEstimate(
            flops=flops, transcendentals=0, bytes_accessed=bytes_accessed),
    )(x, *kernel_params)


# --------------------------------------------------------------------------------------
# Parameters
# --------------------------------------------------------------------------------------
def init_params(key):
    """Unpadded f32 params mimicking PyTorch nn.Linear default init
    U(-1/sqrt(fan_in), 1/sqrt(fan_in)).  Weights stored [in, out], biases [out]."""
    params = []
    keys = jax.random.split(key, 2 * len(LAYER_DIMS))
    for i, (fan_in, fan_out) in enumerate(LAYER_DIMS):
        bound = 1.0 / (fan_in ** 0.5)
        w = jax.random.uniform(keys[2 * i], (fan_in, fan_out), jnp.float32,
                               minval=-bound, maxval=bound)
        b = jax.random.uniform(keys[2 * i + 1], (fan_out,), jnp.float32,
                               minval=-bound, maxval=bound)
        params.append((w, b))
    return params


def prepare_kernel_params(params):
    """Zero-pad internal dims to 128-lane multiples (boundary dims stay 344);
    cast weights to bf16, keep biases f32 as (1, N) rows."""
    kparams = []
    for (w, b), (ip, op) in zip(params, KERNEL_DIMS):
        fi, fo = w.shape
        w_pad = jnp.zeros((ip, op), jnp.float32).at[:fi, :fo].set(w).astype(jnp.bfloat16)
        b_pad = jnp.zeros((1, op), jnp.float32).at[0, :fo].set(b)
        kparams.extend([w_pad, b_pad])
    return kparams


def reference_forward(x, params):
    """Plain-JAX reference with the same bf16-matmul / f32-accumulate precision strategy."""
    def lin(h, w, b):
        return jnp.dot(h.astype(jnp.bfloat16), w.astype(jnp.bfloat16),
                       preferred_element_type=jnp.float32) + b
    (w1, b1), (w2, b2), (w3, b3), (w4, b4), (w5, b5), (w6, b6) = params
    h = jnp.maximum(lin(x, w1, b1), 0.0)
    h = jnp.maximum(lin(h, w2, b2), 0.0)
    z = lin(h, w3, b3)
    h = jnp.maximum(lin(z, w4, b4), 0.0)
    h = jnp.maximum(lin(h, w5, b5), 0.0)
    return lin(h, w6, b6)


# --------------------------------------------------------------------------------------
if __name__ == "__main__":
    key = jax.random.PRNGKey(0)
    k_params, k_x1, k_x2 = jax.random.split(key, 3)

    params = init_params(k_params)
    kernel_params = prepare_kernel_params(params)

    # Small batch: single grid step, fully aligned block.
    B1 = 8
    x1 = jax.random.normal(k_x1, (B1, IN_DIM), jnp.float32).astype(jnp.bfloat16)
    out1 = jax.block_until_ready(auto_encoder_forward(x1, kernel_params))
    ref1 = reference_forward(x1, params)
    assert out1.shape == (B1, IN_DIM) and out1.dtype == jnp.float32
    assert jnp.allclose(out1, ref1, atol=1e-3, rtol=1e-3)

    # Larger, non-tile-divisible batch: 2 grid steps (v7x dual-TC path) + ragged tail step.
    B2 = 300
    x2 = jax.random.normal(k_x2, (B2, IN_DIM), jnp.float32).astype(jnp.bfloat16)
    out2 = jax.block_until_ready(auto_encoder_forward(x2, kernel_params))
    ref2 = reference_forward(x2, params)
    assert out2.shape == (B2, IN_DIM)
    assert jnp.allclose(out2, ref2, atol=1e-3, rtol=1e-3)

    print("KERNEL_OK")
</pallas_src>

<mosaic_0001>
module attributes {stable_mosaic.version = 11 : i64} {
  func.func @_ae_kernel(%arg0: i32, %arg1: memref<8x344xbf16, #tpu.memory_space<vmem>>, %arg2: memref<344x256xbf16, #tpu.memory_space<vmem>>, %arg3: memref<1x256xf32, #tpu.memory_space<vmem>>, %arg4: memref<256x128xbf16, #tpu.memory_space<vmem>>, %arg5: memref<1x128xf32, #tpu.memory_space<vmem>>, %arg6: memref<128x128xbf16, #tpu.memory_space<vmem>>, %arg7: memref<1x128xf32, #tpu.memory_space<vmem>>, %arg8: memref<128x128xbf16, #tpu.memory_space<vmem>>, %arg9: memref<1x128xf32, #tpu.memory_space<vmem>>, %arg10: memref<128x256xbf16, #tpu.memory_space<vmem>>, %arg11: memref<1x256xf32, #tpu.memory_space<vmem>>, %arg12: memref<256x344xbf16, #tpu.memory_space<vmem>>, %arg13: memref<1x344xf32, #tpu.memory_space<vmem>>, %arg14: memref<8x344xf32, #tpu.memory_space<vmem>>) attributes {dimension_semantics = [#tpu.dimension_semantics<parallel>], iteration_bounds = array<i64: 1>, scalar_prefetch = 0 : i64, scratch_operands = 0 : i64, tpu.core_type = #tpu.core_type<tc>, window_params = [{transform_indices = @transform_0, window_bounds = array<i64: 8, 344>}, {pipeline_mode = #tpu.pipeline_mode<synchronous>, transform_indices = @transform_1, window_bounds = array<i64: 344, 256>}, {pipeline_mode = #tpu.pipeline_mode<synchronous>, transform_indices = @transform_2, window_bounds = array<i64: 1, 256>}, {pipeline_mode = #tpu.pipeline_mode<synchronous>, transform_indices = @transform_3, window_bounds = array<i64: 256, 128>}, {pipeline_mode = #tpu.pipeline_mode<synchronous>, transform_indices = @transform_4, window_bounds = array<i64: 1, 128>}, {pipeline_mode = #tpu.pipeline_mode<synchronous>, transform_indices = @transform_5, window_bounds = array<i64: 128, 128>}, {pipeline_mode = #tpu.pipeline_mode<synchronous>, transform_indices = @transform_6, window_bounds = array<i64: 1, 128>}, {pipeline_mode = #tpu.pipeline_mode<synchronous>, transform_indices = @transform_7, window_bounds = array<i64: 128, 128>}, {pipeline_mode = #tpu.pipeline_mode<synchronous>, transform_indices = @transform_8, window_bounds = array<i64: 1, 128>}, {pipeline_mode = #tpu.pipeline_mode<synchronous>, transform_indices = @transform_9, window_bounds = array<i64: 128, 256>}, {pipeline_mode = #tpu.pipeline_mode<synchronous>, transform_indices = @transform_10, window_bounds = array<i64: 1, 256>}, {pipeline_mode = #tpu.pipeline_mode<synchronous>, transform_indices = @transform_11, window_bounds = array<i64: 256, 344>}, {pipeline_mode = #tpu.pipeline_mode<synchronous>, transform_indices = @transform_12, window_bounds = array<i64: 1, 344>}, {transform_indices = @transform_13, window_bounds = array<i64: 8, 344>}]} {
    %c0 = arith.constant 0 : index
    %c0_0 = arith.constant 0 : index
    %0 = vector.load %arg1[%c0, %c0_0] : memref<8x344xbf16, #tpu.memory_space<vmem>>, vector<8x344xbf16>
    %c0_1 = arith.constant 0 : index
    %c0_2 = arith.constant 0 : index
    %1 = vector.load %arg3[%c0_1, %c0_2] : memref<1x256xf32, #tpu.memory_space<vmem>>, vector<1x256xf32>
    %c0_3 = arith.constant 0 : index
    %c0_4 = arith.constant 0 : index
    %2 = vector.load %arg5[%c0_3, %c0_4] : memref<1x128xf32, #tpu.memory_space<vmem>>, vector<1x128xf32>
    %c0_5 = arith.constant 0 : index
    %c0_6 = arith.constant 0 : index
    %3 = vector.load %arg7[%c0_5, %c0_6] : memref<1x128xf32, #tpu.memory_space<vmem>>, vector<1x128xf32>
    %c0_7 = arith.constant 0 : index
    %c0_8 = arith.constant 0 : index
    %4 = vector.load %arg9[%c0_7, %c0_8] : memref<1x128xf32, #tpu.memory_space<vmem>>, vector<1x128xf32>
    %c0_9 = arith.constant 0 : index
    %c0_10 = arith.constant 0 : index
    %5 = vector.load %arg11[%c0_9, %c0_10] : memref<1x256xf32, #tpu.memory_space<vmem>>, vector<1x256xf32>
    %c0_11 = arith.constant 0 : index
    %c0_12 = arith.constant 0 : index
    %6 = vector.load %arg13[%c0_11, %c0_12] : memref<1x344xf32, #tpu.memory_space<vmem>>, vector<1x344xf32>
    %c0_13 = arith.constant 0 : index
    %c0_14 = arith.constant 0 : index
    %7 = vector.load %arg2[%c0_13, %c0_14] : memref<344x256xbf16, #tpu.memory_space<vmem>>, vector<344x256xbf16>
    %cst = arith.constant dense<0.000000e+00> : vector<8x256xf32>
    %8 = tpu.matmul %0, %7, %cst {dimension_numbers = #tpu.dot_dimension_numbers<[1], [0], [0], [1], [0, 0, 1, 1], [], []>} : vector<8x344xbf16>, vector<344x256xbf16>, vector<8x256xf32> -> vector<8x256xf32>
    %9 = vector.broadcast %1 : vector<1x256xf32> to vector<8x256xf32>
    %10 = arith.addf %8, %9 : vector<8x256xf32>
    %cst_15 = arith.constant 0.000000e+00 : f32
    %11 = vector.broadcast %cst_15 : f32 to vector<8x256xf32>
    %12 = arith.maximumf %10, %11 : vector<8x256xf32>
    %13 = arith.truncf %12 : vector<8x256xf32> to vector<8x256xbf16>
    %c0_16 = arith.constant 0 : index
    %c0_17 = arith.constant 0 : index
    %14 = vector.load %arg4[%c0_16, %c0_17] : memref<256x128xbf16, #tpu.memory_space<vmem>>, vector<256x128xbf16>
    %cst_18 = arith.constant dense<0.000000e+00> : vector<8x128xf32>
    %15 = tpu.matmul %13, %14, %cst_18 {dimension_numbers = #tpu.dot_dimension_numbers<[1], [0], [0], [1], [0, 0, 1, 1], [], []>} : vector<8x256xbf16>, vector<256x128xbf16>, vector<8x128xf32> -> vector<8x128xf32>
    %16 = vector.broadcast %2 : vector<1x128xf32> to vector<8x128xf32>
    %17 = arith.addf %15, %16 : vector<8x128xf32>
    %cst_19 = arith.constant 0.000000e+00 : f32
    %18 = vector.broadcast %cst_19 : f32 to vector<8x128xf32>
    %19 = arith.maximumf %17, %18 : vector<8x128xf32>
    %20 = arith.truncf %19 : vector<8x128xf32> to vector<8x128xbf16>
    %c0_20 = arith.constant 0 : index
    %c0_21 = arith.constant 0 : index
    %21 = vector.load %arg6[%c0_20, %c0_21] : memref<128x128xbf16, #tpu.memory_space<vmem>>, vector<128x128xbf16>
    %cst_22 = arith.constant dense<0.000000e+00> : vector<8x128xf32>
    %22 = tpu.matmul %20, %21, %cst_22 {dimension_numbers = #tpu.dot_dimension_numbers<[1], [0], [0], [1], [0, 0, 1, 1], [], []>} : vector<8x128xbf16>, vector<128x128xbf16>, vector<8x128xf32> -> vector<8x128xf32>
    %23 = vector.broadcast %3 : vector<1x128xf32> to vector<8x128xf32>
    %24 = arith.addf %22, %23 : vector<8x128xf32>
    %25 = arith.truncf %24 : vector<8x128xf32> to vector<8x128xbf16>
    %c0_23 = arith.constant 0 : index
    %c0_24 = arith.constant 0 : index
    %26 = vector.load %arg8[%c0_23, %c0_24] : memref<128x128xbf16, #tpu.memory_space<vmem>>, vector<128x128xbf16>
    %cst_25 = arith.constant dense<0.000000e+00> : vector<8x128xf32>
    %27 = tpu.matmul %25, %26, %cst_25 {dimension_numbers = #tpu.dot_dimension_numbers<[1], [0], [0], [1], [0, 0, 1, 1], [], []>} : vector<8x128xbf16>, vector<128x128xbf16>, vector<8x128xf32> -> vector<8x128xf32>
    %28 = vector.broadcast %4 : vector<1x128xf32> to vector<8x128xf32>
    %29 = arith.addf %27, %28 : vector<8x128xf32>
    %cst_26 = arith.constant 0.000000e+00 : f32
    %30 = vector.broadcast %cst_26 : f32 to vector<8x128xf32>
    %31 = arith.maximumf %29, %30 : vector<8x128xf32>
    %32 = arith.truncf %31 : vector<8x128xf32> to vector<8x128xbf16>
    %c0_27 = arith.constant 0 : index
    %c0_28 = arith.constant 0 : index
    %33 = vector.load %arg10[%c0_27, %c0_28] : memref<128x256xbf16, #tpu.memory_space<vmem>>, vector<128x256xbf16>
    %cst_29 = arith.constant dense<0.000000e+00> : vector<8x256xf32>
    %34 = tpu.matmul %32, %33, %cst_29 {dimension_numbers = #tpu.dot_dimension_numbers<[1], [0], [0], [1], [0, 0, 1, 1], [], []>} : vector<8x128xbf16>, vector<128x256xbf16>, vector<8x256xf32> -> vector<8x256xf32>
    %35 = vector.broadcast %5 : vector<1x256xf32> to vector<8x256xf32>
    %36 = arith.addf %34, %35 : vector<8x256xf32>
    %cst_30 = arith.constant 0.000000e+00 : f32
    %37 = vector.broadcast %cst_30 : f32 to vector<8x256xf32>
    %38 = arith.maximumf %36, %37 : vector<8x256xf32>
    %39 = arith.truncf %38 : vector<8x256xf32> to vector<8x256xbf16>
    %c0_31 = arith.constant 0 : index
    %c0_32 = arith.constant 0 : index
    %40 = vector.load %arg12[%c0_31, %c0_32] : memref<256x344xbf16, #tpu.memory_space<vmem>>, vector<256x344xbf16>
    %cst_33 = arith.constant dense<0.000000e+00> : vector<8x344xf32>
    %41 = tpu.matmul %39, %40, %cst_33 {dimension_numbers = #tpu.dot_dimension_numbers<[1], [0], [0], [1], [0, 0, 1, 1], [], []>} : vector<8x256xbf16>, vector<256x344xbf16>, vector<8x344xf32> -> vector<8x344xf32>
    %42 = vector.broadcast %6 : vector<1x344xf32> to vector<8x344xf32>
    %43 = arith.addf %41, %42 : vector<8x344xf32>
    %c0_34 = arith.constant 0 : index
    %c0_35 = arith.constant 0 : index
    %44 = vector.load %arg14[%c0_34, %c0_35] : memref<8x344xf32, #tpu.memory_space<vmem>>, vector<8x344xf32>
    tpu.vector_store %arg14[%c0_34, %c0_35], %43 {strides = array<i32>} : memref<8x344xf32, #tpu.memory_space<vmem>>, vector<8x344xf32>,
    return
  }
  func.func @transform_0(%arg0: i32) -> (i32, i32) {
    %c0_i32 = arith.constant 0 : i32
    %c0_i32_0 = arith.constant 0 : i32
    return %arg0, %c0_i32 : i32, i32
  }
  func.func @transform_1(%arg0: i32) -> (i32, i32) {
    %c0_i32 = arith.constant 0 : i32
    %c0_i32_0 = arith.constant 0 : i32
    %c0_i32_1 = arith.constant 0 : i32
    return %c0_i32, %c0_i32_0 : i32, i32
  }
  func.func @transform_2(%arg0: i32) -> (i32, i32) {
    %c0_i32 = arith.constant 0 : i32
    %c0_i32_0 = arith.constant 0 : i32
    %c0_i32_1 = arith.constant 0 : i32
    return %c0_i32, %c0_i32_0 : i32, i32
  }
  func.func @transform_3(%arg0: i32) -> (i32, i32) {
    %c0_i32 = arith.constant 0 : i32
    %c0_i32_0 = arith.constant 0 : i32
    %c0_i32_1 = arith.constant 0 : i32
    return %c0_i32, %c0_i32_0 : i32, i32
  }
  func.func @transform_4(%arg0: i32) -> (i32, i32) {
    %c0_i32 = arith.constant 0 : i32
    %c0_i32_0 = arith.constant 0 : i32
    %c0_i32_1 = arith.constant 0 : i32
    return %c0_i32, %c0_i32_0 : i32, i32
  }
  func.func @transform_5(%arg0: i32) -> (i32, i32) {
    %c0_i32 = arith.constant 0 : i32
    %c0_i32_0 = arith.constant 0 : i32
    %c0_i32_1 = arith.constant 0 : i32
    return %c0_i32, %c0_i32_0 : i32, i32
  }
  func.func @transform_6(%arg0: i32) -> (i32, i32) {
    %c0_i32 = arith.constant 0 : i32
    %c0_i32_0 = arith.constant 0 : i32
    %c0_i32_1 = arith.constant 0 : i32
    return %c0_i32, %c0_i32_0 : i32, i32
  }
  func.func @transform_7(%arg0: i32) -> (i32, i32) {
    %c0_i32 = arith.constant 0 : i32
    %c0_i32_0 = arith.constant 0 : i32
    %c0_i32_1 = arith.constant 0 : i32
    return %c0_i32, %c0_i32_0 : i32, i32
  }
  func.func @transform_8(%arg0: i32) -> (i32, i32) {
    %c0_i32 = arith.constant 0 : i32
    %c0_i32_0 = arith.constant 0 : i32
    %c0_i32_1 = arith.constant 0 : i32
    return %c0_i32, %c0_i32_0 : i32, i32
  }
  func.func @transform_9(%arg0: i32) -> (i32, i32) {
    %c0_i32 = arith.constant 0 : i32
    %c0_i32_0 = arith.constant 0 : i32
    %c0_i32_1 = arith.constant 0 : i32
    return %c0_i32, %c0_i32_0 : i32, i32
  }
  func.func @transform_10(%arg0: i32) -> (i32, i32) {
    %c0_i32 = arith.constant 0 : i32
    %c0_i32_0 = arith.constant 0 : i32
    %c0_i32_1 = arith.constant 0 : i32
    return %c0_i32, %c0_i32_0 : i32, i32
  }
  func.func @transform_11(%arg0: i32) -> (i32, i32) {
    %c0_i32 = arith.constant 0 : i32
    %c0_i32_0 = arith.constant 0 : i32
    %c0_i32_1 = arith.constant 0 : i32
    return %c0_i32, %c0_i32_0 : i32, i32
  }
  func.func @transform_12(%arg0: i32) -> (i32, i32) {
    %c0_i32 = arith.constant 0 : i32
    %c0_i32_0 = arith.constant 0 : i32
    %c0_i32_1 = arith.constant 0 : i32
    return %c0_i32, %c0_i32_0 : i32, i32
  }
  func.func @transform_13(%arg0: i32) -> (i32, i32) {
    %c0_i32 = arith.constant 0 : i32
    %c0_i32_0 = arith.constant 0 : i32
    return %arg0, %c0_i32 : i32, i32
  }
}

</mosaic_0001>

<bundles_post_ra>
// kernel: tpu_custom_call.1
= control target key start
LH: loop header
LB: loop body
LE: loop exit
PB: predicated region body
PF: predicated region fallthrough
CT: control target
= control target key end

     0   :  { %18 = vsyncpa [#allocation3], 0  ;;  %s2500_s0 = inlined_call_operand.hbm [shape: bf16[8,344], index: 0, kind: input, shape index: {}]   ;;  %s2501_s1 = inlined_call_operand.vmem [shape: bf16[344,256], index: 1, kind: input, shape index: {}]   ;;  %s2502_s2 = inlined_call_operand.vmem [shape: f32[1,256], index: 2, kind: input, shape index: {}]   ;;  %s2503_s3 = inlined_call_operand.vmem [shape: bf16[256,128], index: 3, kind: input, shape index: {}]   ;;  %s2504_s4 = inlined_call_operand.vmem [shape: f32[1,128], index: 4, kind: input, shape index: {}]   ;;  %s2505_s5 = inlined_call_operand.vmem [shape: bf16[128,128], index: 5, kind: input, shape index: {}]   ;;  %s2506_s6 = inlined_call_operand.vmem [shape: f32[1,128], index: 6, kind: input, shape index: {}]   ;;  %s2507_s7 = inlined_call_operand.vmem [shape: bf16[128,128], index: 7, kind: input, shape index: {}]   ;;  %s2508_s8 = inlined_call_operand.vmem [shape: f32[1,128], index: 8, kind: input, shape index: {}]   ;;  %s2509_s9 = inlined_call_operand.vmem [shape: bf16[128,256], index: 9, kind: input, shape index: {}]   ;;  %s2510_s10 = inlined_call_operand.vmem [shape: f32[1,256], index: 10, kind: input, shape index: {}]   ;;  %s2511_s11 = inlined_call_operand.vmem [shape: bf16[256,344], index: 11, kind: input, shape index: {}]   ;;  %s2512_s12 = inlined_call_operand.vmem [shape: f32[1,344], index: 12, kind: input, shape index: {}]   ;;  %s2513_s13 = inlined_call_operand.hbm [shape: f32[8,344], index: 13, kind: output, shape index: {}]  }
   0x1   :  { %19 = vsyncpa [#allocation4], 0  ;;  %s1925_s25 = smov [#allocation2]   ;;  %s1877_s29 = scalar_lea.hbm %s2500_s0, 192 }
   0x2   :  { %s26_s26 = sshll.u32 %s1925_s25, 4  ;;  %p1878_p0 = scmp.ne.s32.totalorder %s2500_s0, %s1877_s29  ;;  %s27_s26 = int_to_ptr.vmem [resolvable:$true] %s26_s26 }
   0x3   :  { %p1881_p1 = scmp.lt.u32.totalorder %s1877_s29, %s2500_s0 }
   0x5   :  { %p1883_p2 = pnand %p1881_p1, %p1878_p0 }
   0x7   :  { %1886 = shalt.err (!%p1883_p2)
}
   0x8   :  { %s1887_s17 = scalar_lea.vmem %s27_s26, 192  ;;  %p1892_p4 = scmp.lt.s32.totalorder %s27_s26, %s27_s26 }
   0x9   :  { %p1888_p3 = scmp.ne.s32.totalorder %s27_s26, %s1887_s17  ;;  %p1893_p5 = scmp.lt.s32.totalorder %s1887_s17, %s1887_s17 }
   0xb   :  { %p1894_p6 = por %p1893_p5, %p1892_p4 }
   0xd   :  { %p1895_p7 = pnand %p1894_p6, %p1888_p3 }
   0xf   :  { %1898 = shalt.err (!%p1895_p7)
}
  0x10   :  { %29 = dma.hbm_to_vmem [thread:$0]  %s2500_s0, 192, %s27_s26, [#allocation3]  }
  0x11   :  { %1921 = dma.done.wait [#allocation3], 192  }
  0x12   :  { %1922 = vsyncadd [#allocation3], 4294967104  ;;  %v1689_v0 = vld [vmem:[%s2501_s1 + $0x4] ss:$8 sps:$4 sm:$0xff]   ;;  %v1691_v1 = vld [vmem:[%s2501_s1] ss:$8 sps:$4 sm:$0xff]  }
  0x13   :  { %356 = vmatprep.subr.bf16.mxu0 %v1689_v0  ;;  %v1692_v2 = vld [vmem:[%s2501_s1 + $0x14] ss:$8 sps:$4 sm:$0xff]   ;;  %v1694_v3 = vld [vmem:[%s2501_s1 + $0x10] ss:$8 sps:$4 sm:$0xff]   ;;  %v1695_v4 = vld [vmem:[%s2501_s1 + $0x24] ss:$8 sps:$4 sm:$0xff]  }
  0x14   :  { %357 = vmatpush1.bf16.msra.mxu0 %v1691_v1  ;;  %v1697_v5 = vld [vmem:[%s2501_s1 + $0x20] ss:$8 sps:$4 sm:$0xff]   ;;  %v1698_v6 = vld [vmem:[%s2501_s1 + $0x34] ss:$8 sps:$4 sm:$0xff]   ;;  %v1700_v7 = vld [vmem:[%s2501_s1 + $0x30] ss:$8 sps:$4 sm:$0xff]  }
  0x15   :  { %358 = vmatprep.subr.bf16.mxu0 %v1692_v2  ;;  %v1701_v8 = vld [vmem:[%s2501_s1 + $0x44] ss:$8 sps:$4 sm:$0xff]   ;;  %v1703_v9 = vld [vmem:[%s2501_s1 + $0x40] ss:$8 sps:$4 sm:$0xff]   ;;  %v1704_v10 = vld [vmem:[%s2501_s1 + $0x54] ss:$8 sps:$4 sm:$0xff]  }
  0x16   :  { %v1706_v11 = vld [vmem:[%s2501_s1 + $0x50] ss:$8 sps:$4 sm:$0xff]   ;;  %v1707_v12 = vld [vmem:[%s2501_s1 + $0x64] ss:$8 sps:$4 sm:$0xff]   ;;  %v1709_v15 = vld [vmem:[%s2501_s1 + $0x60] ss:$8 sps:$4 sm:$0xff]  }
  0x17   :  { %v2051_v13 = vld [vmem:[#allocation2] sm:$0xff]  ;;  %v1710_v16 = vld [vmem:[%s2501_s1 + $0x74] ss:$8 sps:$4 sm:$0xff]   ;;  %v1712_v17 = vld [vmem:[%s2501_s1 + $0x70] ss:$8 sps:$4 sm:$0xff]   ;;  %v1926_v52 = vmov 0  }
  0x18   :  { %359 = vmatpush1.bf16.msra.mxu0 %v1694_v3  ;;  %v1429_v14 = vcombine.high %v2051_v13, %v2051_v13  ;;  %v1713_v18 = vld [vmem:[%s2501_s1 + $0x84] ss:$8 sps:$4 sm:$0xff]   ;;  %v1715_v19 = vld [vmem:[%s2501_s1 + $0x80] ss:$8 sps:$4 sm:$0xff]   ;;  %v1716_v20 = vld [vmem:[%s2501_s1 + $0x94] ss:$8 sps:$4 sm:$0xff]   ;;  %v1428_v48 = vcombine.low %v2051_v13, %v2051_v13 }
  0x19   :  { %360 = vmatprep.subr.bf16.mxu0 %v1695_v4  ;;  %v1757_v21 = vld [vmem:[%s2503_s3 + $0x40] sm:$0xff]   ;;  %v1759_v23 = vld [vmem:[%s2503_s3 + $0x48] sm:$0xff]   ;;  %v1761_v25 = vld [vmem:[%s2503_s3 + $0x50] sm:$0xff]   ;;  %vm349_vm0 = vcmask 1043456   ;;  %vm345_vm1 = vcmask 719872   ;;  %v1927_v3 = vmov 0.0   ;;  %v110_v4 = vlaneseq }
  0x1a   :  { %388 = vmatprep.mubr.bf16.mxu0 %v1429_v14  ;;  %v1758_v22 = vld [vmem:[%s2503_s3] sm:$0xff]   ;;  %1576 = vmatprep.subr.bf16.mxu1 %v1757_v21  ;;  %v1760_v24 = vld [vmem:[%s2503_s3 + $0x8] sm:$0xff]   ;;  %v1718_v26 = vld [vmem:[%s2501_s1 + $0x90] ss:$8 sps:$4 sm:$0xff]   ;;  %vm1928_vm2 = vmmov 0   ;;  %s1929_s25 = smov [#allocation5]  }
  0x1b   :  { %1577 = vmatpush3.bf16.msra.mxu1 %v1758_v22  ;;  %v1719_v27 = vld [vmem:[%s2501_s1 + $0xa4] ss:$8 sps:$4 sm:$0xff]   ;;  %v1762_v28 = vld [vmem:[%s2503_s3 + $0x10] sm:$0xff]   ;;  %v1763_v29 = vld [vmem:[%s2503_s3 + $0x58] sm:$0xff]   ;;  %s1419_s27 = sshll.u32 %s1929_s25, 4  ;;  %s1420_s27 = int_to_ptr.vmem [resolvable:$true] %s1419_s27 }
  0x1c   :  { %361 = vmatpush1.bf16.msra.mxu0 %v1697_v5  ;;  %1578 = vmatprep.subr.bf16.mxu1 %v1759_v23  ;;  %v1721_v30 = vld [vmem:[%s2501_s1 + $0xa0] ss:$8 sps:$4 sm:$0xff]   ;;  %v1722_v31 = vld [vmem:[%s2501_s1 + $0xb4] ss:$8 sps:$4 sm:$0xff]   ;;  %v1724_v32 = vld [vmem:[%s2501_s1 + $0xb0] ss:$8 sps:$4 sm:$0xff]   ;;  %p1904_p9 = scmp.lt.s32.totalorder %s1420_s27, %s1420_s27 }
  0x1d   :  { %362 = vmatprep.subr.bf16.mxu0 %v1698_v6  ;;  %v1764_v33 = vld [vmem:[%s2503_s3 + $0x18] sm:$0xff]   ;;  %v1765_v34 = vld [vmem:[%s2503_s3 + $0x60] sm:$0xff]   ;;  %v1767_v37 = vld [vmem:[%s2503_s3 + $0x68] sm:$0xff]   ;;  %v2197_v5 = vshrl.u32 %v110_v4, 7 }
  0x1e   :  { %v1725_v35 = vld [vmem:[%s2501_s1 + $0xc4] ss:$8 sps:$4 sm:$0xff]   ;;  %v1727_v38 = vld [vmem:[%s2501_s1 + $0xc0] ss:$8 sps:$4 sm:$0xff]   ;;  %v1728_v39 = vld [vmem:[%s2501_s1 + $0xd4] ss:$8 sps:$4 sm:$0xff]  }
  0x1f   :  { %1579 = vmatpush3.bf16.msra.mxu1 %v1760_v24  ;;  %v1766_v36 = vld [vmem:[%s2503_s3 + $0x20] sm:$0xff]   ;;  %v1768_v40 = vld [vmem:[%s2503_s3 + $0x28] sm:$0xff]   ;;  %v1730_v41 = vld [vmem:[%s2501_s1 + $0xd0] ss:$8 sps:$4 sm:$0xff]   ;;  %v2200_v6 = vsub.s32 0, %v2197_v5 }
  0x20   :  { %363 = vmatpush1.bf16.msra.mxu0 %v1700_v7  ;;  %1580 = vmatprep.subr.bf16.mxu1 %v1761_v25  ;;  %v1731_v42 = vld [vmem:[%s2501_s1 + $0xe4] ss:$8 sps:$4 sm:$0xff]   ;;  %v1733_v43 = vld [vmem:[%s2501_s1 + $0xe0] ss:$8 sps:$4 sm:$0xff]   ;;  %v1734_v44 = vld [vmem:[%s2501_s1 + $0xf4] ss:$8 sps:$4 sm:$0xff]  }
  0x21   :  { %364 = vmatprep.subr.bf16.mxu0 %v1701_v8  ;;  %v1736_v45 = vld [vmem:[%s2501_s1 + $0xf0] ss:$8 sps:$4 sm:$0xff]   ;;  %v1741_v46 = vld [vmem:[%s2501_s1 + $0x104] ss:$8 sps:$4 sm:$0xff]   ;;  %v1739_v47 = vld [vmem:[%s2501_s1 + $0x100] ss:$8 sps:$4 sm:$0xff]  }
  0x22   :  { %v1744_v49 = vld [vmem:[%s2501_s1 + $0x114] ss:$8 sps:$4 sm:$0xff]   ;;  %v1742_v50 = vld [vmem:[%s2501_s1 + $0x110] ss:$8 sps:$4 sm:$0xff]   ;;  %v1747_v51 = vld [vmem:[%s2501_s1 + $0x124] ss:$8 sps:$4 sm:$0xff]  }
  0x23   :  { %1581 = vmatpush3.bf16.msra.mxu1 %v1762_v28  ;;  %v1745_v53 = vld [vmem:[%s2501_s1 + $0x120] ss:$8 sps:$4 sm:$0xff]   ;;  %v1750_v54 = vld [vmem:[%s2501_s1 + $0x134] ss:$8 sps:$4 sm:$0xff]   ;;  %v1748_v55 = vld [vmem:[%s2501_s1 + $0x130] ss:$8 sps:$4 sm:$0xff]  }
  0x24   :  { %365 = vmatpush1.bf16.msra.mxu0 %v1703_v9  ;;  %1582 = vmatprep.subr.bf16.mxu1 %v1763_v29  ;;  %v1753_v56 = vld [vmem:[%s2501_s1 + $0x144] ss:$8 sps:$4 sm:$0xff]   ;;  %v108_v57 = vld [vmem:[%s2501_s1 + $0x150] sm:$0xff]  ;;  %v1751_v58 = vld [vmem:[%s2501_s1 + $0x140] ss:$8 sps:$4 sm:$0xff]   ;;  %v2206_v8 = vsub.s32 1, %v2197_v5 }
  0x25   :  { %366 = vmatprep.subr.bf16.mxu0 %v1704_v10  ;;  %v1474_v59 = vcombine.high %v108_v57, %v108_v57  ;;  %v1473_v60 = vcombine.low %v108_v57, %v108_v57  ;;  %v1756_v62 = vld [vmem:[#allocation2 + $0x8] ss:$0 sps:$4 sm:$0xff]   ;;  %v1769_v63 = vld [vmem:[%s2503_s3 + $0x70] sm:$0xff]   ;;  %v1771_v1 = vld [vmem:[%s2503_s3 + $0x78] sm:$0xff]  }
  0x26   :  { %v1770_v0 = vld [vmem:[%s2503_s3 + $0x30] sm:$0xff]   ;;  %v1772_v2 = vld [vmem:[%s2503_s3 + $0x38] sm:$0xff]   ;;  %v60_v7 = vld [vmem:[%s2502_s2] sm:$0x3] }
  0x27   :  { %1583 = vmatpush3.bf16.msra.mxu1 %v1764_v33  ;;  %v351_v61 = vsel %vm349_vm0, %v1473_v60, 0  ;;  %v113_v9 = vrot.slane %v60_v7, %v2200_v6  ;;  %v117_v10 = vrot.slane %v60_v7, %v2206_v8  ;;  %v1774_v22 = vld [vmem:[%s2505_s5 + $0x8] sm:$0xff]   ;;  %v1775_v23 = vld [vmem:[%s2505_s5 + $0x10] sm:$0xff]   ;;  %v1776_v24 = vld [vmem:[%s2505_s5 + $0x18] sm:$0xff]  }
  0x28   :  { %367 = vmatpush1.bf16.msra.mxu0 %v1706_v11  ;;  %1584 = vmatprep.subr.bf16.mxu1 %v1765_v34  ;;  %v1777_v25 = vld [vmem:[%s2505_s5 + $0x20] sm:$0xff]   ;;  %v1780_v28 = vld [vmem:[%s2505_s5 + $0x38] sm:$0xff]  }
  0x29   :  { %368 = vmatprep.subr.bf16.mxu0 %v1707_v12  ;;  %v1804_v57 = vld [vmem:[%s2509_s9 + $0x50] ss:$8 sps:$4 sm:$0xff]   ;;  %v1494_v60 = vld [vmem:[%s2506_s6] ss:$0 sm:$0xff] }
  0x2a   :  { %v1810_v4 = vld [vmem:[%s2509_s9 + $0x70] ss:$8 sps:$4 sm:$0xff]   ;;  %v1813_v7 = vld [vmem:[%s2511_s11] ss:$12 sps:$4 sm:$0xff]  }
  0x2b   :  { %1585 = vmatpush3.bf16.msra.mxu1 %v1766_v36 }
  0x2c   :  { %369 = vmatpush1.bf16.msra.mxu0 %v1709_v15  ;;  %1586 = vmatprep.subr.bf16.mxu1 %v1767_v37  ;;  %v1781_v37 = vld [vmem:[%s2507_s7] sm:$0xff]  }
  0x2d   :  { %370 = vmatprep.subr.bf16.mxu0 %v1710_v16 }
  0x2f   :  { %1587 = vmatpush3.bf16.msra.mxu1 %v1768_v40  ;;  %v1783_v40 = vld [vmem:[%s2507_s7 + $0x10] sm:$0xff]  }
  0x30   :  { %371 = vmatpush1.bf16.msra.mxu0 %v1712_v17  ;;  %1588 = vmatprep.subr.bf16.mxu1 %v1769_v63 }
  0x31   :  { %372 = vmatprep.subr.bf16.mxu0 %v1713_v18 }
  0x33   :  { %1589 = vmatpush3.bf16.msra.mxu1 %v1770_v0 }
  0x34   :  { %373 = vmatpush1.bf16.msra.mxu0 %v1715_v19  ;;  %1590 = vmatprep.subr.bf16.mxu1 %v1771_v1 }
  0x35   :  { %374 = vmatprep.subr.bf16.mxu0 %v1716_v20  ;;  %v1773_v20 = vld [vmem:[%s2505_s5] sm:$0xff]  }
  0x37   :  { %1591 = vmatpush3.bf16.msra.mxu1 %v1772_v2 }
  0x38   :  { %375 = vmatpush1.bf16.msra.mxu0 %v1718_v26  ;;  %1638 = vmatprep.subr.bf16.mxu1 %v1927_v3  ;;  %v1778_v26 = vld [vmem:[%s2505_s5 + $0x28] sm:$0xff]  }
  0x39   :  { %376 = vmatprep.subr.bf16.mxu0 %v1719_v27  ;;  %v1779_v27 = vld [vmem:[%s2505_s5 + $0x30] sm:$0xff]  }
  0x3c   :  { %377 = vmatpush1.bf16.msra.mxu0 %v1721_v30  ;;  %v1477_v30 = vld [vmem:[%s2504_s4] ss:$0 sm:$0xff] }
  0x3d   :  { %378 = vmatprep.subr.bf16.mxu0 %v1722_v31 }
  0x40   :  { %379 = vmatpush1.bf16.msra.mxu0 %v1724_v32 }
  0x41   :  { %380 = vmatprep.subr.bf16.mxu0 %v1725_v35 }
  0x44   :  { %381 = vmatpush1.bf16.msra.mxu0 %v1727_v38 }
  0x45   :  { %382 = vmatprep.subr.bf16.mxu0 %v1728_v39  ;;  %v1782_v39 = vld [vmem:[%s2507_s7 + $0x8] sm:$0xff]  }
  0x48   :  { %383 = vmatpush1.bf16.msra.mxu0 %v1730_v41  ;;  %v1784_v41 = vld [vmem:[%s2507_s7 + $0x18] sm:$0xff]  }
  0x49   :  { %384 = vmatprep.subr.bf16.mxu0 %v1731_v42  ;;  %v1785_v42 = vld [vmem:[%s2507_s7 + $0x20] sm:$0xff]  }
  0x4c   :  { %385 = vmatpush1.bf16.msra.mxu0 %v1733_v43  ;;  %v1786_v43 = vld [vmem:[%s2507_s7 + $0x28] sm:$0xff]  }
  0x4d   :  { %386 = vmatprep.subr.bf16.mxu0 %v1734_v44  ;;  %v1787_v44 = vld [vmem:[%s2507_s7 + $0x30] sm:$0xff]  }
  0x50   :  { %387 = vmatpush1.bf16.msra.mxu0 %v1736_v45  ;;  %v1788_v45 = vld [vmem:[%s2507_s7 + $0x38] sm:$0xff]  }
  0x51   :  { %397 = vmatprep.subr.bf16.mxu0 %v1741_v46  ;;  %v1789_v46 = vld [vmem:[%s2509_s9] ss:$8 sps:$4 sm:$0xff]  }
  0x53   :  { %389 = vmatmul.mubr.bf16.vlgmr.msra.gmra.mrb[0].mxu0 %v1428_v48  ;;  %v1794_v48 = vld [vmem:[%s2509_s9 + $0x14] ss:$8 sps:$4 sm:$0xff]  }
  0x54   :  { %398 = vmatpush1.bf16.msra.mxu0 %v1739_v47  ;;  %429 = vmatprep.mubr.bf16.mxu0 %v1926_v52  ;;  %v1791_v47 = vld [vmem:[%s2509_s9 + $0x4] ss:$8 sps:$4 sm:$0xff]  }
  0x55   :  { %399 = vmatprep.subr.bf16.mxu0 %v1744_v49  ;;  %v1792_v49 = vld [vmem:[%s2509_s9 + $0x10] ss:$8 sps:$4 sm:$0xff]  }
  0x58   :  { %400 = vmatpush1.bf16.msra.mxu0 %v1742_v50  ;;  %v1797_v50 = vld [vmem:[%s2509_s9 + $0x24] ss:$8 sps:$4 sm:$0xff]  }
  0x59   :  { %401 = vmatprep.subr.bf16.mxu0 %v1747_v51  ;;  %v1795_v51 = vld [vmem:[%s2509_s9 + $0x20] ss:$8 sps:$4 sm:$0xff]  }
  0x5c   :  { %402 = vmatpush1.bf16.msra.mxu0 %v1745_v53  ;;  %v1798_v53 = vld [vmem:[%s2509_s9 + $0x30] ss:$8 sps:$4 sm:$0xff]  }
  0x5d   :  { %403 = vmatprep.subr.bf16.mxu0 %v1750_v54  ;;  %v1803_v54 = vld [vmem:[%s2509_s9 + $0x44] ss:$8 sps:$4 sm:$0xff]  }
  0x60   :  { %404 = vmatpush1.bf16.msra.mxu0 %v1748_v55  ;;  %v1801_v55 = vld [vmem:[%s2509_s9 + $0x40] ss:$8 sps:$4 sm:$0xff]  }
  0x61   :  { %405 = vmatprep.subr.bf16.mxu0 %v1753_v56  ;;  %v1806_v56 = vld [vmem:[%s2509_s9 + $0x54] ss:$8 sps:$4 sm:$0xff]  }
  0x64   :  { %406 = vmatpush1.bf16.msra.mxu0 %v1751_v58  ;;  %v1809_v58 = vld [vmem:[%s2509_s9 + $0x64] ss:$8 sps:$4 sm:$0xff]  }
  0x65   :  { %1475 = vmatprep.subr.msk.bf16.mxu0 %vm349_vm0, %v1474_v59  ;;  %v1807_v59 = vld [vmem:[%s2509_s9 + $0x60] ss:$8 sps:$4 sm:$0xff]  }
  0x68   :  { %408 = vmatpush1.bf16.msra.mxu0 %v351_v61 }
  0x69   :  { %948 = vmatprep.subr.bf16.mxu0 %v1791_v47  ;;  %v1846_v47 = vld [vmem:[%s2511_s11 + $0x20] ss:$12 sps:$4 sm:$0xff]  }
  0x6b   :  { %1476 = vmatmul.mubr.msk.bf16.vlgmr.msra.gmra.mrb[0].mxu0 %vm345_vm1, %v1756_v62 }
  0x6c   :  { %980 = vmatprep.mubr.bf16.mxu0 %v1926_v52  ;;  %949 = vmatpush1.bf16.msra.mxu0 %v1789_v46  ;;  %v1800_v52 = vld [vmem:[%s2509_s9 + $0x34] ss:$8 sps:$4 sm:$0xff]   ;;  %v1845_v46 = vld [vmem:[%s2511_s11 + $0xe0] ss:$12 sps:$4 sm:$0xff]  }
  0x6d   :  { %950 = vmatprep.subr.bf16.mxu0 %v1794_v48  ;;  %v1850_v48 = vld [vmem:[%s2511_s11 + $0xf8] ss:$12 sps:$4 sm:$0xff]  }
  0x70   :  { %951 = vmatpush1.bf16.msra.mxu0 %v1792_v49  ;;  %v1851_v49 = vld [vmem:[%s2511_s11 + $0x38] ss:$12 sps:$4 sm:$0xff]  }
  0x71   :  { %952 = vmatprep.subr.bf16.mxu0 %v1797_v50  ;;  %v1855_v50 = vld [vmem:[%s2511_s11 + $0x110] ss:$12 sps:$4 sm:$0xff]  }
  0x74   :  { %953 = vmatpush1.bf16.msra.mxu0 %v1795_v51  ;;  %v1856_v51 = vld [vmem:[%s2511_s11 + $0x50] ss:$12 sps:$4 sm:$0xff]  }
  0x75   :  { %954 = vmatprep.subr.bf16.mxu0 %v1800_v52  ;;  %v1860_v52 = vld [vmem:[%s2511_s11 + $0x128] ss:$12 sps:$4 sm:$0xff]  }
  0x78   :  { %955 = vmatpush1.bf16.msra.mxu0 %v1798_v53  ;;  %v1861_v53 = vld [vmem:[%s2511_s11 + $0x68] ss:$12 sps:$4 sm:$0xff]  }
  0x79   :  { %956 = vmatprep.subr.bf16.mxu0 %v1803_v54  ;;  %v1865_v54 = vld [vmem:[%s2511_s11 + $0x140] ss:$12 sps:$4 sm:$0xff]  }
  0x7c   :  { %957 = vmatpush1.bf16.msra.mxu0 %v1801_v55  ;;  %v1866_v55 = vld [vmem:[%s2511_s11 + $0x80] ss:$12 sps:$4 sm:$0xff]  }
  0x7d   :  { %958 = vmatprep.subr.bf16.mxu0 %v1806_v56  ;;  %v1869_v56 = vld [vmem:[%s2511_s11 + $0x154] ss:$12 sps:$4 sm:$0xff]  }
  0x80   :  { %959 = vmatpush1.bf16.msra.mxu0 %v1804_v57  ;;  %v1870_v57 = vld [vmem:[%s2511_s11 + $0x158] ss:$12 sps:$4 sm:$0xff]  }
  0x81   :  { %960 = vmatprep.subr.bf16.mxu0 %v1809_v58  ;;  %v1867_v58 = vld [vmem:[%s2511_s11 + $0x150] ss:$12 sps:$4 sm:$0xff]  }
  0x84   :  { %961 = vmatpush1.bf16.msra.mxu0 %v1807_v59  ;;  %v1871_v59 = vld [vmem:[%s2511_s11 + $0x98] ss:$12 sps:$4 sm:$0xff]  }
 0x13e   :  { %v431_v11 = vpop.f32.mrb[0].mxu0 }
 0x13f   :  { %v1678_v12 = vadd.f32 %v431_v11, %v113_v9  ;;  %v433_v13 = vpop.f32.mrb[1].mxu0  ;;  %v1815_v9 = vld [vmem:[%s2511_s11 + $0x4] ss:$12 sps:$4 sm:$0xff]  }
 0x140   :  { %v1679_v14 = vadd.f32 %v433_v13, %v117_v10  ;;  %v435_v15 = vpop.f32.mrb[2].mxu0  ;;  %v1818_v10 = vld [vmem:[%s2511_s11 + $0x1c] ss:$12 sps:$4 sm:$0xff]   ;;  %v1816_v11 = vld [vmem:[%s2511_s11 + $0x18] ss:$12 sps:$4 sm:$0xff]  }
 0x141   :  { %v438_v16 = vmax.f32 %v1678_v12, 0.0  ;;  %v436_v17 = vpop.f32.mrb[3].mxu0  ;;  %v1821_v12 = vld [vmem:[%s2511_s11 + $0x34] ss:$12 sps:$4 sm:$0xff]   ;;  %v1824_v15 = vld [vmem:[%s2511_s11 + $0x4c] ss:$12 sps:$4 sm:$0xff]  }
 0x142   :  { %v439_v18 = vmax.f32 %v1679_v14, 0.0  ;;  %v1840_v13 = vld [vmem:[%s2511_s11 + $0xc8] ss:$12 sps:$4 sm:$0xff]   ;;  %v1819_v14 = vld [vmem:[%s2511_s11 + $0x30] ss:$12 sps:$4 sm:$0xff]  }
 0x143   :  { %v440_v21 = vpack.c.bf16 %v438_v16, %v438_v16  ;;  %v1822_v16 = vld [vmem:[%s2511_s11 + $0x48] ss:$12 sps:$4 sm:$0xff]   ;;  %v1827_v17 = vld [vmem:[%s2511_s11 + $0x64] ss:$12 sps:$4 sm:$0xff]  }
 0x144   :  { %v441_v19 = vpack.c.bf16 %v439_v18, %v439_v18  ;;  %v1825_v18 = vld [vmem:[%s2511_s11 + $0x60] ss:$12 sps:$4 sm:$0xff]  }
 0x146   :  { %608 = vmatprep.mubr.bf16.mxu1 %v441_v19  ;;  %v1830_v19 = vld [vmem:[%s2511_s11 + $0x7c] ss:$12 sps:$4 sm:$0xff]  }
 0x147   :  { %609 = vmatmul.mubr.bf16.vlgmr.msra.gmra.mrb[0].mxu1 %v440_v21  ;;  %v1833_v21 = vld [vmem:[%s2511_s11 + $0x94] ss:$12 sps:$4 sm:$0xff]  }
 0x148   :  { %1639 = vmatpush3.bf16.msra.mxu1 %v1773_v20  ;;  %1654 = vmatprep.mubr.msk.bf16.mxu1 %vm1928_vm2, %v1927_v3  ;;  %v1828_v20 = vld [vmem:[%s2511_s11 + $0x78] ss:$12 sps:$4 sm:$0xff]  }
 0x149   :  { %1640 = vmatprep.subr.bf16.mxu1 %v1927_v3 }
 0x14c   :  { %1641 = vmatpush3.bf16.msra.mxu1 %v1774_v22  ;;  %v1831_v22 = vld [vmem:[%s2511_s11 + $0x90] ss:$12 sps:$4 sm:$0xff]  }
 0x14d   :  { %1642 = vmatprep.subr.bf16.mxu1 %v1927_v3 }
 0x150   :  { %1643 = vmatpush3.bf16.msra.mxu1 %v1775_v23  ;;  %v1836_v23 = vld [vmem:[%s2511_s11 + $0xac] ss:$12 sps:$4 sm:$0xff]  }
 0x151   :  { %1644 = vmatprep.subr.bf16.mxu1 %v1927_v3 }
 0x154   :  { %1645 = vmatpush3.bf16.msra.mxu1 %v1776_v24  ;;  %v1834_v24 = vld [vmem:[%s2511_s11 + $0xa8] ss:$12 sps:$4 sm:$0xff]  }
 0x155   :  { %1646 = vmatprep.subr.bf16.mxu1 %v1927_v3 }
 0x158   :  { %1647 = vmatpush3.bf16.msra.mxu1 %v1777_v25  ;;  %v1839_v25 = vld [vmem:[%s2511_s11 + $0xc4] ss:$12 sps:$4 sm:$0xff]  }
 0x159   :  { %1648 = vmatprep.subr.bf16.mxu1 %v1927_v3 }
 0x15c   :  { %1649 = vmatpush3.bf16.msra.mxu1 %v1778_v26  ;;  %v1837_v26 = vld [vmem:[%s2511_s11 + $0xc0] ss:$12 sps:$4 sm:$0xff]  }
 0x15d   :  { %1650 = vmatprep.subr.bf16.mxu1 %v1927_v3 }
 0x160   :  { %1651 = vmatpush3.bf16.msra.mxu1 %v1779_v27  ;;  %v1844_v27 = vld [vmem:[%s2511_s11 + $0xdc] ss:$12 sps:$4 sm:$0xff]  }
 0x161   :  { %1652 = vmatprep.subr.bf16.mxu1 %v1927_v3 }
 0x164   :  { %1653 = vmatpush3.bf16.msra.mxu1 %v1780_v28  ;;  %v1842_v28 = vld [vmem:[%s2511_s11 + $0xd8] ss:$12 sps:$4 sm:$0xff]  }
 0x165   :  { %1658 = vmatprep.subr.bf16.mxu1 %v1927_v3 }
 0x21a   :  { %v1592_v29 = vpop.f32.mrb[0].mxu1 }
 0x21b   :  { %v1593_v31 = vpop.f32.mrb[1].mxu1 }
 0x21c   :  { %v1594_v32 = vadd.f32 %v1593_v31, %v1592_v29  ;;  %v1595_v33 = vpop.f32.mrb[2].mxu1  ;;  %v1849_v29 = vld [vmem:[%s2511_s11 + $0xf4] ss:$12 sps:$4 sm:$0xff]   ;;  %v1854_v31 = vld [vmem:[%s2511_s11 + $0x10c] ss:$12 sps:$4 sm:$0xff]  }
 0x21d   :  { %v1596_v34 = vpop.f32.mrb[3].mxu1  ;;  %v1859_v33 = vld [vmem:[%s2511_s11 + $0x124] ss:$12 sps:$4 sm:$0xff]  }
 0x21e   :  { %v611_v35 = vadd.f32 %v1594_v32, %v1477_v30  ;;  %v1847_v30 = vld [vmem:[%s2511_s11 + $0xf0] ss:$12 sps:$4 sm:$0xff]   ;;  %v1852_v32 = vld [vmem:[%s2511_s11 + $0x108] ss:$12 sps:$4 sm:$0xff]   ;;  %v1857_v34 = vld [vmem:[%s2511_s11 + $0x120] ss:$12 sps:$4 sm:$0xff]  }
 0x220   :  { %v616_v36 = vmax.f32 %v611_v35, 0.0  ;;  %v1864_v35 = vld [vmem:[%s2511_s11 + $0x13c] ss:$12 sps:$4 sm:$0xff]  }
 0x222   :  { %v617_v38 = vpack.c.bf16 %v616_v36, %v616_v36  ;;  %v1862_v36 = vld [vmem:[%s2511_s11 + $0x138] ss:$12 sps:$4 sm:$0xff]  }
 0x224   :  { %1655 = vmatmul.mubr.bf16.vlgmr.msra.gmra.mrb[4].mxu1 %v617_v38 }
 0x225   :  { %1659 = vmatpush3.bf16.msra.mxu1 %v1781_v37  ;;  %1674 = vmatprep.mubr.msk.bf16.mxu1 %vm1928_vm2, %v1927_v3  ;;  %v1503_v37 = vld [vmem:[%s2508_s8] ss:$0 sm:$0xff] }
 0x226   :  { %1660 = vmatprep.subr.bf16.mxu1 %v1927_v3 }
 0x229   :  { %1661 = vmatpush3.bf16.msra.mxu1 %v1782_v39 }
 0x22a   :  { %1662 = vmatprep.subr.bf16.mxu1 %v1927_v3 }
 0x22d   :  { %1663 = vmatpush3.bf16.msra.mxu1 %v1783_v40 }
 0x22e   :  { %1664 = vmatprep.subr.bf16.mxu1 %v1927_v3 }
 0x231   :  { %1665 = vmatpush3.bf16.msra.mxu1 %v1784_v41 }
 0x232   :  { %1666 = vmatprep.subr.bf16.mxu1 %v1927_v3 }
 0x235   :  { %1667 = vmatpush3.bf16.msra.mxu1 %v1785_v42 }
 0x236   :  { %1668 = vmatprep.subr.bf16.mxu1 %v1927_v3 }
 0x239   :  { %1669 = vmatpush3.bf16.msra.mxu1 %v1786_v43 }
 0x23a   :  { %1670 = vmatprep.subr.bf16.mxu1 %v1927_v3 }
 0x23d   :  { %1671 = vmatpush3.bf16.msra.mxu1 %v1787_v44  ;;  %v1841_v44 = vld [vmem:[%s2511_s11 + $0x8] ss:$12 sps:$4 sm:$0xff]  }
 0x23e   :  { %1672 = vmatprep.subr.bf16.mxu1 %v1927_v3  ;;  %v1812_v3 = vld [vmem:[%s2509_s9 + $0x74] ss:$8 sps:$4 sm:$0xff]  }
 0x23f   :  { %962 = vmatprep.subr.bf16.mxu0 %v1812_v3 }
 0x240   :  { %963 = vmatpush1.bf16.msra.mxu0 %v1810_v4 }
 0x241   :  { %1673 = vmatpush3.bf16.msra.mxu1 %v1788_v45  ;;  %1616 = vmatprep.subr.bf16.mxu0 %v1840_v13 }
 0x242   :  { %1329 = vmatprep.subr.bf16.mxu1 %v1815_v9 }
 0x2f7   :  { %v722_v61 = vpop.f32.mrb[4].mxu1 }
 0x2f8   :  { %v723_v62 = vadd.f32 %v1494_v60, %v722_v61  ;;  %v1656_v63 = vpop.f32.mrb[5].mxu1  ;;  %v1874_v60 = vld [vmem:[%s2511_s11 + $0x16c] ss:$12 sps:$4 sm:$0xff]   ;;  %v1875_v61 = vld [vmem:[%s2511_s11 + $0x170] ss:$12 sps:$4 sm:$0xff]  }
 0x2f9   :  { %v725_v0 = vpop.f32.mrb[6].mxu1  ;;  %v1876_v63 = vld [vmem:[%s2511_s11 + $0xb0] ss:$12 sps:$4 sm:$0xff]  }
 0x2fa   :  { %v728_v1 = vpack.c.bf16 %v723_v62, %v723_v62  ;;  %v1657_v2 = vpop.f32.mrb[7].mxu1  ;;  %v1872_v62 = vld [vmem:[%s2511_s11 + $0x168] ss:$12 sps:$4 sm:$0xff]   ;;  %v64_v0 = vld [vmem:[%s2510_s10] sm:$0x3] }
 0x2fb   :  { %v865_v2 = vrot.slane %v64_v0, %v2206_v8 }
 0x2fc   :  { %1675 = vmatmul.mubr.bf16.vlgmr.msra.gmra.mrb[8].mxu1 %v728_v1  ;;  %v861_v1 = vrot.slane %v64_v0, %v2200_v6 }
 0x2fd   :  { %1330 = vmatpush1.bf16.msra.mxu1 %v1813_v7 }
 0x2fe   :  { %1331 = vmatprep.subr.bf16.mxu1 %v1818_v10 }
 0x301   :  { %1332 = vmatpush1.bf16.msra.mxu1 %v1816_v11 }
 0x302   :  { %1333 = vmatprep.subr.bf16.mxu1 %v1821_v12 }
 0x305   :  { %1334 = vmatpush1.bf16.msra.mxu1 %v1819_v14 }
 0x306   :  { %1335 = vmatprep.subr.bf16.mxu1 %v1824_v15 }
 0x309   :  { %1336 = vmatpush1.bf16.msra.mxu1 %v1822_v16  ;;  %v65_v16 = vld [vmem:[%s2512_s12] sm:$0x7]  ;;  %s1899_s12 = scalar_lea.vmem %s1420_s27, 384 }
 0x30a   :  { %1337 = vmatprep.subr.bf16.mxu1 %v1827_v17  ;;  %v1068_v17 = vsub.s32 2, %v2197_v5  ;;  %p1900_p8 = scmp.ne.s32.totalorder %s1420_s27, %s1899_s12  ;;  %p1905_p10 = scmp.lt.s32.totalorder %s1899_s12, %s1899_s12 }
 0x30c   :  { %p1906_p11 = por %p1905_p10, %p1904_p9 }
 0x30d   :  { %1338 = vmatpush1.bf16.msra.mxu1 %v1825_v18  ;;  %v1061_v18 = vrot.slane %v65_v16, %v2200_v6 }
 0x30e   :  { %1339 = vmatprep.subr.bf16.mxu1 %v1830_v19  ;;  %v1065_v19 = vrot.slane %v65_v16, %v2206_v8  ;;  %p1907_p12 = pnand %p1906_p11, %p1900_p8 }
 0x311   :  { %1340 = vmatpush1.bf16.msra.mxu1 %v1828_v20 }
 0x312   :  { %1341 = vmatprep.subr.bf16.mxu1 %v1833_v21 }
 0x315   :  { %1342 = vmatpush1.bf16.msra.mxu1 %v1831_v22  ;;  %v1069_v22 = vrot.slane %v65_v16, %v1068_v17 }
 0x316   :  { %1343 = vmatprep.subr.bf16.mxu1 %v1836_v23 }
 0x319   :  { %1344 = vmatpush1.bf16.msra.mxu1 %v1834_v24 }
 0x31a   :  { %1345 = vmatprep.subr.bf16.mxu1 %v1839_v25 }
 0x31d   :  { %1346 = vmatpush1.bf16.msra.mxu1 %v1837_v26 }
 0x31e   :  { %1347 = vmatprep.subr.bf16.mxu1 %v1844_v27 }
 0x321   :  { %1348 = vmatpush1.bf16.msra.mxu1 %v1842_v28 }
 0x322   :  { %1349 = vmatprep.subr.bf16.mxu1 %v1849_v29 }
 0x325   :  { %1350 = vmatpush1.bf16.msra.mxu1 %v1847_v30 }
 0x326   :  { %1351 = vmatprep.subr.bf16.mxu1 %v1854_v31 }
 0x329   :  { %1352 = vmatpush1.bf16.msra.mxu1 %v1852_v32 }
 0x32a   :  { %1353 = vmatprep.subr.bf16.mxu1 %v1859_v33 }
 0x32d   :  { %1354 = vmatpush1.bf16.msra.mxu1 %v1857_v34 }
 0x32e   :  { %1355 = vmatprep.subr.bf16.mxu1 %v1864_v35 }
 0x331   :  { %1356 = vmatpush1.bf16.msra.mxu1 %v1862_v36 }
 0x332   :  { %1357 = vmatprep.subr.bf16.mxu1 %v1869_v56 }
 0x335   :  { %1358 = vmatpush1.bf16.msra.mxu1 %v1867_v58 }
 0x336   :  { %1359 = vmatprep.subr.bf16.mxu1 %v1874_v60 }
 0x339   :  { %1360 = vmatpush1.bf16.msra.mxu1 %v1872_v62 }
 0x3cf   :  { %v833_v38 = vpop.f32.mrb[8].mxu1 }
 0x3d0   :  { %v834_v39 = vadd.f32 %v1503_v37, %v833_v38  ;;  %v1676_v40 = vpop.f32.mrb[9].mxu1 }
 0x3d1   :  { %v836_v41 = vpop.f32.mrb[10].mxu1 }
 0x3d2   :  { %v839_v42 = vmax.f32 %v834_v39, 0.0  ;;  %v1677_v43 = vpop.f32.mrb[11].mxu1 }
 0x3d4   :  { %v840_v45 = vpack.c.bf16 %v839_v42, %v839_v42 }
 0x3d6   :  { %981 = vmatmul.mubr.bf16.vlgmr.msra.gmra.mrb[4].mxu0 %v840_v45 }
 0x3d7   :  { %1617 = vmatpush3.bf16.msra.mxu0 %v1841_v44 }
 0x3d8   :  { %1618 = vmatprep.subr.bf16.mxu0 %v1845_v46 }
 0x3db   :  { %1619 = vmatpush3.bf16.msra.mxu0 %v1846_v47 }
 0x3dc   :  { %1620 = vmatprep.subr.bf16.mxu0 %v1850_v48 }
 0x3df   :  { %1621 = vmatpush3.bf16.msra.mxu0 %v1851_v49 }
 0x3e0   :  { %1622 = vmatprep.subr.bf16.mxu0 %v1855_v50 }
 0x3e3   :  { %1623 = vmatpush3.bf16.msra.mxu0 %v1856_v51 }
 0x3e4   :  { %1624 = vmatprep.subr.bf16.mxu0 %v1860_v52 }
 0x3e7   :  { %1625 = vmatpush3.bf16.msra.mxu0 %v1861_v53 }
 0x3e8   :  { %1626 = vmatprep.subr.bf16.mxu0 %v1865_v54 }
 0x3eb   :  { %1627 = vmatpush3.bf16.msra.mxu0 %v1866_v55 }
 0x3ec   :  { %1628 = vmatprep.subr.bf16.mxu0 %v1870_v57 }
 0x3ef   :  { %1629 = vmatpush3.bf16.msra.mxu0 %v1871_v59 }
 0x3f0   :  { %1630 = vmatprep.subr.bf16.mxu0 %v1875_v61 }
 0x3f3   :  { %1631 = vmatpush3.bf16.msra.mxu0 %v1876_v63 }
 0x4a9   :  { %v982_v3 = vpop.f32.mrb[4].mxu0 }
 0x4aa   :  { %v983_v4 = vadd.f32 %v982_v3, %v861_v1  ;;  %v984_v7 = vpop.f32.mrb[5].mxu0 }
 0x4ab   :  { %v985_v9 = vadd.f32 %v984_v7, %v865_v2  ;;  %v986_v10 = vpop.f32.mrb[6].mxu0 }
 0x4ac   :  { %v989_v11 = vmax.f32 %v983_v4, 0.0  ;;  %v987_v12 = vpop.f32.mrb[7].mxu0 }
 0x4ad   :  { %v990_v13 = vmax.f32 %v985_v9, 0.0 }
 0x4ae   :  { %v991_v15 = vpack.c.bf16 %v989_v11, %v989_v11 }
 0x4af   :  { %v992_v14 = vpack.c.bf16 %v990_v13, %v990_v13 }
 0x4b1   :  { %1361 = vmatprep.mubr.bf16.mxu1 %v992_v14  ;;  %1402 = vmatprep.mubr.bf16.mxu0 %v992_v14 }
 0x4b2   :  { %1362 = vmatmul.mubr.bf16.vlgmr.msra.gmra.mrb[12].mxu1 %v991_v15  ;;  %1403 = vmatmul.mubr.bf16.vlgmr.msra.gmra.mrb[8].mxu0 %v991_v15 }
 0x585   :  { %v1363_v20 = vpop.f32.mrb[12].mxu1  ;;  %v1632_v21 = vpop.f32.mrb[8].mxu0 }
 0x586   :  { %v1364_v23 = vadd.f32 %v1363_v20, %v1061_v18  ;;  %v1365_v24 = vpop.f32.mrb[13].mxu1  ;;  %v1633_v25 = vpop.f32.mrb[9].mxu0 }
 0x587   :  { %v1366_v26 = vadd.f32 %v1365_v24, %v1065_v19  ;;  %v1634_v27 = vadd.f32 %v1633_v25, %v1632_v21  ;;  %v1367_v28 = vpop.f32.mrb[14].mxu1  ;;  %v1635_v29 = vpop.f32.mrb[10].mxu0 }
 0x588   :  { %1410 = vst [vmem:[#allocation5] sm:$0xff] %v1364_v23  ;;  %v1368_v30 = vpop.f32.mrb[15].mxu1  ;;  %v1636_v31 = vpop.f32.mrb[11].mxu0 }
 0x589   :  { %1411 = vst [vmem:[#allocation5 + $0x8] sm:$0xff] %v1366_v26  ;;  %v1405_v5 = vadd.f32 %v1634_v27, %v1069_v22 }
 0x58b   :  { %1412 = vst.msk [vmem:[#allocation5 + $0x10] sm:$0xff] %vm345_vm1, %v1405_v5 }
 0x58c   :  { %1910 = shalt.err (!%p1907_p12)
}
 0x58d   :  { %s1911_s7 = scalar_lea.hbm %s2513_s13, 384 }
 0x58e   :  { %p1912_p13 = scmp.ne.s32.totalorder %s2513_s13, %s1911_s7  ;;  %p1915_p0 = scmp.lt.u32.totalorder %s1911_s7, %s2513_s13 }
 0x590   :  { %p1917_p1 = pnand %p1915_p0, %p1912_p13 }
 0x592   :  { %1920 = shalt.err (!%p1917_p1)
}
 0x593   :  { %1422 = dma.vmem_to_hbm [thread:$0]  %s1420_s27, 384, %s2513_s13, [#allocation4]  }
 0x594   :  { %1923 = dma.done.wait [#allocation4], 384  }
 0x595   :  { %1924 = vsyncadd [#allocation4], 4294966912 }
 0x596   :  { %1426 = vsyncpa [#allocation3], 1 }
 0x597   :  { %1427 = vsyncpa [#allocation4], 1 }

</bundles_post_ra>
